<compile_context>
chip_gen: v5e
topology: v5e:2x2
jax: 0.10.0
libtpu: 0.0.40
codegen_flags: <defaults>
</compile_context>

<pallas_src>
import functools

import jax
import jax.numpy as jnp
from jax.experimental import pallas as pl
from jax.experimental.pallas import tpu as pltpu

EPS = 1e-5


def _round_up(a, b):
    return (a + b - 1) // b * b


def _device_caps():
    """(max tile rows, vmem_limit_bytes), generation dependent."""
    try:
        kind = jax.devices()[0].device_kind.lower()
    except Exception:  # pragma: no cover
        kind = ""
    if "v5" in kind or "v6" in kind:          # 128 MiB physical VMEM
        return 16384, 96 * 1024 * 1024
    return 8192, 48 * 1024 * 1024             # v7x (64 MiB VMEM) / unknown


# ----------------------------- kernel helpers --------------------------------


def _layer1(x_ref, w1_ref, b1_ref):
    """relu(x @ W1 + b1); x/W1 are bf16, accumulation in f32."""
    h = jnp.dot(x_ref[...], w1_ref[...],
                preferred_element_type=jnp.float32) + b1_ref[...]
    return jnp.maximum(h, 0.0)


def _mask_rows(h, row_offset, rows):
    """Zero rows whose global index >= rows (padded rows)."""
    row = jax.lax.broadcasted_iota(jnp.int32, h.shape, 0) + row_offset
    return jnp.where(row < rows, h, 0.0)


def _bn_train(h, gamma, beta, rows, masked):
    """Exact two-pass train-mode BatchNorm1d over the rows (f32)."""
    inv_n = 1.0 / rows
    hm = _mask_rows(h, 0, rows) if masked else h
    mean = jnp.sum(hm, axis=0, keepdims=True) * inv_n
    d = h - mean
    if masked:
        d = _mask_rows(d, 0, rows)
    var = jnp.sum(d * d, axis=0, keepdims=True) * inv_n
    scale = gamma * jax.lax.rsqrt(var + EPS)
    return (h - mean) * scale + beta


def _write_partials(h, s_ref, ss_ref, *, rows, tile_rows, masked):
    """Per-tile f32 column sum / sum-of-squares partials (8 identical rows)."""
    def emit(hh):
        s = jnp.sum(hh, axis=0, keepdims=True)
        ss = jnp.sum(hh * hh, axis=0, keepdims=True)
        s_ref[...] = jnp.broadcast_to(s, s_ref.shape)
        ss_ref[...] = jnp.broadcast_to(ss, ss_ref.shape)

    if masked:
        i = pl.program_id(0)
        last = pl.num_programs(0) - 1

        @pl.when(i == last)          # only the ragged edge tile pays the mask
        def _():
            emit(_mask_rows(h, i * tile_rows, rows))

        @pl.when(i < last)
        def _():
            emit(h)
    else:
        emit(h)


# ----------------------------- kernels ----------------------------------------


def _fused_kernel(x_ref, w1_ref, b1_ref, g1_ref, be1_ref,
                  w2_ref, b2_ref, g2_ref, be2_ref, w3_ref, b3_ref,
                  o_ref, *, rows, masked):
    """Single-tile fast path: whole forward incl. BN stats in one kernel."""
    h1 = _layer1(x_ref, w1_ref, b1_ref)
    h1 = _bn_train(h1, g1_ref[...], be1_ref[...], rows, masked)
    h2 = jnp.dot(h1.astype(jnp.bfloat16), w2_ref[...],
                 preferred_element_type=jnp.float32) + b2_ref[...]
    h2 = jnp.maximum(h2, 0.0)
    h2 = _bn_train(h2, g2_ref[...], be2_ref[...], rows, masked)
    out = jnp.dot(h2.astype(jnp.bfloat16), w3_ref[...],
                  preferred_element_type=jnp.float32) + b3_ref[...]
    o_ref[...] = out.astype(o_ref.dtype)


def _stats1_kernel(x_ref, w1_ref, b1_ref, s_ref, ss_ref,
                   *, rows, tile_rows, masked):
    h1 = _layer1(x_ref, w1_ref, b1_ref)
    _write_partials(h1, s_ref, ss_ref, rows=rows, tile_rows=tile_rows,
                    masked=masked)


def _stats2_kernel(x_ref, w1_ref, b1_ref, a1_ref, c1_ref, w2_ref, b2_ref,
                   s_ref, ss_ref, *, rows, tile_rows, masked):
    h1 = _layer1(x_ref, w1_ref, b1_ref)
    h1 = h1 * a1_ref[...] + c1_ref[...]                      # folded BN1
    h2 = jnp.dot(h1.astype(jnp.bfloat16), w2_ref[...],
                 preferred_element_type=jnp.float32) + b2_ref[...]
    h2 = jnp.maximum(h2, 0.0)
    _write_partials(h2, s_ref, ss_ref, rows=rows, tile_rows=tile_rows,
                    masked=masked)


def _forward_kernel(x_ref, w1_ref, b1_ref, a1_ref, c1_ref,
                    w2_ref, b2_ref, a2_ref, c2_ref, w3_ref, b3_ref, o_ref):
    h1 = _layer1(x_ref, w1_ref, b1_ref)
    h1 = h1 * a1_ref[...] + c1_ref[...]                      # folded BN1
    h2 = jnp.dot(h1.astype(jnp.bfloat16), w2_ref[...],
                 preferred_element_type=jnp.float32) + b2_ref[...]
    h2 = jnp.maximum(h2, 0.0)
    h2 = h2 * a2_ref[...] + c2_ref[...]                      # folded BN2
    out = jnp.dot(h2.astype(jnp.bfloat16), w3_ref[...],
                  preferred_element_type=jnp.float32) + b3_ref[...]
    o_ref[...] = out.astype(o_ref.dtype)


# ----------------------------- wrapper ----------------------------------------


def _bn_scale_shift(s, ss, rows, gamma, beta):
    """Fold train-mode BN (biased var, eps=1e-5) into scale/shift (f32)."""
    mean = s / rows
    var = jnp.maximum(ss / rows - mean * mean, 0.0)
    scale = gamma.reshape(-1) * jax.lax.rsqrt(var + EPS)
    shift = beta.reshape(-1) - mean * scale
    return (scale.reshape(1, -1).astype(jnp.float32),
            shift.reshape(1, -1).astype(jnp.float32))


def _reduce_partials(s_part, ss_part, nt, width):
    s = s_part.reshape(nt, 8, width)[:, 0, :].sum(axis=0)
    ss = ss_part.reshape(nt, 8, width)[:, 0, :].sum(axis=0)
    return s, ss


def emg_mlp_encoder(x, params, *, tile_cap=None, vmem_limit=None):
    """x: (B, N, C_in) -> (B, N, C_out), matching EMGMLPEncoder.forward."""
    (w1, b1, g1, be1, w2, b2, g2, be2, w3, b3) = params
    B, N, C = x.shape
    R = B * N
    H1, H2, OUT = w1.shape[1], w2.shape[1], w3.shape[1]

    cap_default, vmem_default = _device_caps()
    tile_cap = cap_default if tile_cap is None else tile_cap
    vmem_limit = vmem_default if vmem_limit is None else vmem_limit
    cp = pltpu.CompilerParams(dimension_semantics=("parallel",),
                              vmem_limit_bytes=vmem_limit)

    # Resident params: bf16 weights for the MXU, f32 bias / BN vectors.
    w1b, w2b, w3b = (w.astype(jnp.bfloat16) for w in (w1, w2, w3))
    b1r, b2r, b3r = (b.reshape(1, -1).astype(jnp.float32) for b in (b1, b2, b3))
    g1r, be1r, g2r, be2r = (v.reshape(1, -1).astype(jnp.float32)
                            for v in (g1, be1, g2, be2))

    full = lambda a: pl.BlockSpec(a.shape, lambda i: (0, 0))

    # x streamed from HBM as bf16 (it only feeds bf16 matmuls).
    x_flat = x.reshape(R, C).astype(jnp.bfloat16)

    # -------- fused single-tile fast path ------------------------------------
    if R <= tile_cap:
        r8 = max(8, _round_up(R, 8))
        x2 = x_flat if r8 == R else jnp.pad(x_flat, ((0, r8 - R), (0, 0)))
        out = pl.pallas_call(
            functools.partial(_fused_kernel, rows=R, masked=(r8 != R)),
            grid=(1,),
            in_specs=[pl.BlockSpec((r8, C), lambda i: (0, 0)),
                      full(w1b), full(b1r), full(g1r), full(be1r),
                      full(w2b), full(b2r), full(g2r), full(be2r),
                      full(w3b), full(b3r)],
            out_specs=pl.BlockSpec((r8, OUT), lambda i: (0, 0)),
            out_shape=jax.ShapeDtypeStruct((r8, OUT), jnp.float32),
            compiler_params=cp,
        )(x2, w1b, b1r, g1r, be1r, w2b, b2r, g2r, be2r, w3b, b3r)
        return out[:R].reshape(B, N, OUT)

    # -------- tiled three-pass path (R > tile_cap) ----------------------------
    nt = -(-R // tile_cap)                      # cdiv
    tr = _round_up(-(-R // nt), 8)              # balanced tile, sublane aligned
    r_pad = tr * nt
    masked = (r_pad != R)
    x2 = x_flat if not masked else jnp.pad(x_flat, ((0, r_pad - R), (0, 0)))

    row_in = pl.BlockSpec((tr, C), lambda i: (i, 0))
    part_spec = lambda h: pl.BlockSpec((8, h), lambda i: (i, 0))
    part_shape = lambda h: jax.ShapeDtypeStruct((nt * 8, h), jnp.float32)

    # pass 1: per-tile partial sum / sumsq of relu(x @ W1 + b1)
    s1p, ss1p = pl.pallas_call(
        functools.partial(_stats1_kernel, rows=R, tile_rows=tr, masked=masked),
        grid=(nt,),
        in_specs=[row_in, full(w1b), full(b1r)],
        out_specs=(part_spec(H1), part_spec(H1)),
        out_shape=(part_shape(H1), part_shape(H1)),
        compiler_params=cp,
    )(x2, w1b, b1r)
    a1, c1 = _bn_scale_shift(*_reduce_partials(s1p, ss1p, nt, H1), R, g1r, be1r)

    # pass 2: recompute layer 1, apply folded BN1, partial stats of layer 2
    s2p, ss2p = pl.pallas_call(
        functools.partial(_stats2_kernel, rows=R, tile_rows=tr, masked=masked),
        grid=(nt,),
        in_specs=[row_in, full(w1b), full(b1r), full(a1), full(c1),
                  full(w2b), full(b2r)],
        out_specs=(part_spec(H2), part_spec(H2)),
        out_shape=(part_shape(H2), part_shape(H2)),
        compiler_params=cp,
    )(x2, w1b, b1r, a1, c1, w2b, b2r)
    a2, c2 = _bn_scale_shift(*_reduce_partials(s2p, ss2p, nt, H2), R, g2r, be2r)

    # pass 3: full forward with both BNs folded to scale/shift
    out = pl.pallas_call(
        _forward_kernel,
        grid=(nt,),
        in_specs=[row_in, full(w1b), full(b1r), full(a1), full(c1),
                  full(w2b), full(b2r), full(a2), full(c2),
                  full(w3b), full(b3r)],
        out_specs=pl.BlockSpec((tr, OUT), lambda i: (i, 0)),
        out_shape=jax.ShapeDtypeStruct((r_pad, OUT), jnp.float32),
        compiler_params=cp,
    )(x2, w1b, b1r, a1, c1, w2b, b2r, a2, c2, w3b, b3r)

    return out[:R].reshape(B, N, OUT)


# ----------------------------- reference & init --------------------------------


def emg_mlp_reference(x, params):
    (w1, b1, g1, be1, w2, b2, g2, be2, w3, b3) = params
    B, N, C = x.shape
    h = x.reshape(-1, C)

    def bn(h, g, be):
        mean = h.mean(axis=0)
        var = ((h - mean) ** 2).mean(axis=0)
        return (h - mean) * jax.lax.rsqrt(var + EPS) * g.reshape(-1) + be.reshape(-1)

    h = bn(jnp.maximum(h @ w1 + b1, 0.0), g1, be1)
    h = bn(jnp.maximum(h @ w2 + b2, 0.0), g2, be2)
    h = h @ w3 + b3
    return h.reshape(B, N, -1)


def init_params(key, input_dim, output_dim, hidden_dims=(64, 128)):
    dims = [input_dim] + list(hidden_dims) + [output_dim]
    params = []
    keys = jax.random.split(key, 2 * (len(dims) - 1))
    for i in range(len(dims) - 1):
        fan_in, fan_out = dims[i], dims[i + 1]
        bound = 1.0 / float(fan_in) ** 0.5
        w = jax.random.uniform(keys[2 * i], (fan_in, fan_out),
                               minval=-bound, maxval=bound, dtype=jnp.float32)
        b = jax.random.uniform(keys[2 * i + 1], (1, fan_out),
                               minval=-bound, maxval=bound, dtype=jnp.float32)
        params.append(w)
        params.append(b)
        if i < len(dims) - 2:
            params.append(jnp.ones((1, fan_out), jnp.float32))   # BN gamma
            params.append(jnp.zeros((1, fan_out), jnp.float32))  # BN beta
    return tuple(params)


if __name__ == "__main__":
    B, N = 2, 8
    input_dim, output_dim = 16, 32
    hidden_dims = (64, 128)

    key = jax.random.PRNGKey(0)
    kx, kp, kx2 = jax.random.split(key, 3)
    x = jax.random.normal(kx, (B, N, input_dim), dtype=jnp.float32)
    params = init_params(kp, input_dim, output_dim, hidden_dims)

    # Fast (fused single-tile) path.
    out = jax.jit(emg_mlp_encoder)(x, params)
    jax.block_until_ready(out)
    assert out.shape == (B, N, output_dim), out.shape
    assert bool(jnp.isfinite(out).all())
    ref = emg_mlp_reference(x, params)
    max_diff = float(jnp.max(jnp.abs(out - ref)))
    assert max_diff < 0.5, f"fast path max |pallas - reference| = {max_diff}"

    # Tiled three-pass path (forced tiny tile cap; includes a ragged last tile).
    x2 = jax.random.normal(kx2, (2, 9, input_dim), dtype=jnp.float32)
    out2 = jax.jit(lambda a, p: emg_mlp_encoder(a, p, tile_cap=8))(x2, params)
    jax.block_until_ready(out2)
    assert out2.shape == (2, 9, output_dim), out2.shape
    assert bool(jnp.isfinite(out2).all())
    ref2 = emg_mlp_reference(x2, params)
    max_diff2 = float(jnp.max(jnp.abs(out2 - ref2)))
    assert max_diff2 < 0.5, f"tiled path max |pallas - reference| = {max_diff2}"

    print("KERNEL_OK")
</pallas_src>

<mosaic_0001>
module attributes {stable_mosaic.version = 11 : i64} {
  func.func @_fused_kernel(%arg0: i32, %arg1: memref<16x16xbf16, #tpu.memory_space<vmem>>, %arg2: memref<16x64xbf16, #tpu.memory_space<vmem>>, %arg3: memref<1x64xf32, #tpu.memory_space<vmem>>, %arg4: memref<1x64xf32, #tpu.memory_space<vmem>>, %arg5: memref<1x64xf32, #tpu.memory_space<vmem>>, %arg6: memref<64x128xbf16, #tpu.memory_space<vmem>>, %arg7: memref<1x128xf32, #tpu.memory_space<vmem>>, %arg8: memref<1x128xf32, #tpu.memory_space<vmem>>, %arg9: memref<1x128xf32, #tpu.memory_space<vmem>>, %arg10: memref<128x32xbf16, #tpu.memory_space<vmem>>, %arg11: memref<1x32xf32, #tpu.memory_space<vmem>>, %arg12: memref<16x32xf32, #tpu.memory_space<vmem>>) attributes {dimension_semantics = [#tpu.dimension_semantics<parallel>], iteration_bounds = array<i64: 1>, scalar_prefetch = 0 : i64, scratch_operands = 0 : i64, tpu.core_type = #tpu.core_type<tc>, window_params = [{pipeline_mode = #tpu.pipeline_mode<synchronous>, transform_indices = @transform_0, window_bounds = array<i64: 16, 16>}, {pipeline_mode = #tpu.pipeline_mode<synchronous>, transform_indices = @transform_1, window_bounds = array<i64: 16, 64>}, {pipeline_mode = #tpu.pipeline_mode<synchronous>, transform_indices = @transform_2, window_bounds = array<i64: 1, 64>}, {pipeline_mode = #tpu.pipeline_mode<synchronous>, transform_indices = @transform_3, window_bounds = array<i64: 1, 64>}, {pipeline_mode = #tpu.pipeline_mode<synchronous>, transform_indices = @transform_4, window_bounds = array<i64: 1, 64>}, {pipeline_mode = #tpu.pipeline_mode<synchronous>, transform_indices = @transform_5, window_bounds = array<i64: 64, 128>}, {pipeline_mode = #tpu.pipeline_mode<synchronous>, transform_indices = @transform_6, window_bounds = array<i64: 1, 128>}, {pipeline_mode = #tpu.pipeline_mode<synchronous>, transform_indices = @transform_7, window_bounds = array<i64: 1, 128>}, {pipeline_mode = #tpu.pipeline_mode<synchronous>, transform_indices = @transform_8, window_bounds = array<i64: 1, 128>}, {pipeline_mode = #tpu.pipeline_mode<synchronous>, transform_indices = @transform_9, window_bounds = array<i64: 128, 32>}, {pipeline_mode = #tpu.pipeline_mode<synchronous>, transform_indices = @transform_10, window_bounds = array<i64: 1, 32>}, {pipeline_mode = #tpu.pipeline_mode<synchronous>, transform_indices = @transform_11, window_bounds = array<i64: 16, 32>}]} {
    %c0 = arith.constant 0 : index
    %c0_0 = arith.constant 0 : index
    %0 = vector.load %arg1[%c0, %c0_0] : memref<16x16xbf16, #tpu.memory_space<vmem>>, vector<16x16xbf16>
    %c0_1 = arith.constant 0 : index
    %c0_2 = arith.constant 0 : index
    %1 = vector.load %arg2[%c0_1, %c0_2] : memref<16x64xbf16, #tpu.memory_space<vmem>>, vector<16x64xbf16>
    %cst = arith.constant dense<0.000000e+00> : vector<16x64xf32>
    %2 = tpu.matmul %0, %1, %cst {dimension_numbers = #tpu.dot_dimension_numbers<[1], [0], [0], [1], [0, 0, 1, 1], [], []>} : vector<16x16xbf16>, vector<16x64xbf16>, vector<16x64xf32> -> vector<16x64xf32>
    %c0_3 = arith.constant 0 : index
    %c0_4 = arith.constant 0 : index
    %3 = vector.load %arg3[%c0_3, %c0_4] : memref<1x64xf32, #tpu.memory_space<vmem>>, vector<1x64xf32>
    %4 = vector.broadcast %3 : vector<1x64xf32> to vector<16x64xf32>
    %5 = arith.addf %2, %4 : vector<16x64xf32>
    %cst_5 = arith.constant 0.000000e+00 : f32
    %6 = vector.broadcast %cst_5 : f32 to vector<16x64xf32>
    %7 = arith.maximumf %5, %6 : vector<16x64xf32>
    %c0_6 = arith.constant 0 : index
    %c0_7 = arith.constant 0 : index
    %8 = vector.load %arg4[%c0_6, %c0_7] : memref<1x64xf32, #tpu.memory_space<vmem>>, vector<1x64xf32>
    %c0_8 = arith.constant 0 : index
    %c0_9 = arith.constant 0 : index
    %9 = vector.load %arg5[%c0_8, %c0_9] : memref<1x64xf32, #tpu.memory_space<vmem>>, vector<1x64xf32>
    %cst_10 = arith.constant dense<0.000000e+00> : vector<64xf32>
    %10 = vector.multi_reduction <add>, %7, %cst_10 [0] : vector<16x64xf32> to vector<64xf32>
    %11 = vector.shape_cast %10 : vector<64xf32> to vector<1x64xf32>
    %cst_11 = arith.constant 6.250000e-02 : f32
    %12 = vector.broadcast %cst_11 : f32 to vector<1x64xf32>
    %13 = arith.mulf %11, %12 : vector<1x64xf32>
    %14 = vector.broadcast %13 : vector<1x64xf32> to vector<16x64xf32>
    %15 = arith.subf %7, %14 : vector<16x64xf32>
    %16 = arith.mulf %15, %15 : vector<16x64xf32>
    %cst_12 = arith.constant dense<0.000000e+00> : vector<64xf32>
    %17 = vector.multi_reduction <add>, %16, %cst_12 [0] : vector<16x64xf32> to vector<64xf32>
    %18 = vector.shape_cast %17 : vector<64xf32> to vector<1x64xf32>
    %cst_13 = arith.constant 6.250000e-02 : f32
    %19 = vector.broadcast %cst_13 : f32 to vector<1x64xf32>
    %20 = arith.mulf %18, %19 : vector<1x64xf32>
    %cst_14 = arith.constant 9.99999974E-6 : f32
    %21 = vector.broadcast %cst_14 : f32 to vector<1x64xf32>
    %22 = arith.addf %20, %21 : vector<1x64xf32>
    %23 = math.rsqrt %22 : vector<1x64xf32>
    %24 = arith.mulf %8, %23 : vector<1x64xf32>
    %25 = vector.broadcast %13 : vector<1x64xf32> to vector<16x64xf32>
    %26 = arith.subf %7, %25 : vector<16x64xf32>
    %27 = vector.broadcast %24 : vector<1x64xf32> to vector<16x64xf32>
    %28 = arith.mulf %26, %27 : vector<16x64xf32>
    %29 = vector.broadcast %9 : vector<1x64xf32> to vector<16x64xf32>
    %30 = arith.addf %28, %29 : vector<16x64xf32>
    %31 = arith.truncf %30 : vector<16x64xf32> to vector<16x64xbf16>
    %c0_15 = arith.constant 0 : index
    %c0_16 = arith.constant 0 : index
    %32 = vector.load %arg6[%c0_15, %c0_16] : memref<64x128xbf16, #tpu.memory_space<vmem>>, vector<64x128xbf16>
    %cst_17 = arith.constant dense<0.000000e+00> : vector<16x128xf32>
    %33 = tpu.matmul %31, %32, %cst_17 {dimension_numbers = #tpu.dot_dimension_numbers<[1], [0], [0], [1], [0, 0, 1, 1], [], []>} : vector<16x64xbf16>, vector<64x128xbf16>, vector<16x128xf32> -> vector<16x128xf32>
    %c0_18 = arith.constant 0 : index
    %c0_19 = arith.constant 0 : index
    %34 = vector.load %arg7[%c0_18, %c0_19] : memref<1x128xf32, #tpu.memory_space<vmem>>, vector<1x128xf32>
    %35 = vector.broadcast %34 : vector<1x128xf32> to vector<16x128xf32>
    %36 = arith.addf %33, %35 : vector<16x128xf32>
    %cst_20 = arith.constant 0.000000e+00 : f32
    %37 = vector.broadcast %cst_20 : f32 to vector<16x128xf32>
    %38 = arith.maximumf %36, %37 : vector<16x128xf32>
    %c0_21 = arith.constant 0 : index
    %c0_22 = arith.constant 0 : index
    %39 = vector.load %arg8[%c0_21, %c0_22] : memref<1x128xf32, #tpu.memory_space<vmem>>, vector<1x128xf32>
    %c0_23 = arith.constant 0 : index
    %c0_24 = arith.constant 0 : index
    %40 = vector.load %arg9[%c0_23, %c0_24] : memref<1x128xf32, #tpu.memory_space<vmem>>, vector<1x128xf32>
    %cst_25 = arith.constant dense<0.000000e+00> : vector<128xf32>
    %41 = vector.multi_reduction <add>, %38, %cst_25 [0] : vector<16x128xf32> to vector<128xf32>
    %42 = vector.shape_cast %41 : vector<128xf32> to vector<1x128xf32>
    %cst_26 = arith.constant 6.250000e-02 : f32
    %43 = vector.broadcast %cst_26 : f32 to vector<1x128xf32>
    %44 = arith.mulf %42, %43 : vector<1x128xf32>
    %45 = vector.broadcast %44 : vector<1x128xf32> to vector<16x128xf32>
    %46 = arith.subf %38, %45 : vector<16x128xf32>
    %47 = arith.mulf %46, %46 : vector<16x128xf32>
    %cst_27 = arith.constant dense<0.000000e+00> : vector<128xf32>
    %48 = vector.multi_reduction <add>, %47, %cst_27 [0] : vector<16x128xf32> to vector<128xf32>
    %49 = vector.shape_cast %48 : vector<128xf32> to vector<1x128xf32>
    %cst_28 = arith.constant 6.250000e-02 : f32
    %50 = vector.broadcast %cst_28 : f32 to vector<1x128xf32>
    %51 = arith.mulf %49, %50 : vector<1x128xf32>
    %cst_29 = arith.constant 9.99999974E-6 : f32
    %52 = vector.broadcast %cst_29 : f32 to vector<1x128xf32>
    %53 = arith.addf %51, %52 : vector<1x128xf32>
    %54 = math.rsqrt %53 : vector<1x128xf32>
    %55 = arith.mulf %39, %54 : vector<1x128xf32>
    %56 = vector.broadcast %44 : vector<1x128xf32> to vector<16x128xf32>
    %57 = arith.subf %38, %56 : vector<16x128xf32>
    %58 = vector.broadcast %55 : vector<1x128xf32> to vector<16x128xf32>
    %59 = arith.mulf %57, %58 : vector<16x128xf32>
    %60 = vector.broadcast %40 : vector<1x128xf32> to vector<16x128xf32>
    %61 = arith.addf %59, %60 : vector<16x128xf32>
    %62 = arith.truncf %61 : vector<16x128xf32> to vector<16x128xbf16>
    %c0_30 = arith.constant 0 : index
    %c0_31 = arith.constant 0 : index
    %63 = vector.load %arg10[%c0_30, %c0_31] : memref<128x32xbf16, #tpu.memory_space<vmem>>, vector<128x32xbf16>
    %cst_32 = arith.constant dense<0.000000e+00> : vector<16x32xf32>
    %64 = tpu.matmul %62, %63, %cst_32 {dimension_numbers = #tpu.dot_dimension_numbers<[1], [0], [0], [1], [0, 0, 1, 1], [], []>} : vector<16x128xbf16>, vector<128x32xbf16>, vector<16x32xf32> -> vector<16x32xf32>
    %c0_33 = arith.constant 0 : index
    %c0_34 = arith.constant 0 : index
    %65 = vector.load %arg11[%c0_33, %c0_34] : memref<1x32xf32, #tpu.memory_space<vmem>>, vector<1x32xf32>
    %66 = vector.broadcast %65 : vector<1x32xf32> to vector<16x32xf32>
    %67 = arith.addf %64, %66 : vector<16x32xf32>
    %c0_35 = arith.constant 0 : index
    %c0_36 = arith.constant 0 : index
    %68 = vector.load %arg12[%c0_35, %c0_36] : memref<16x32xf32, #tpu.memory_space<vmem>>, vector<16x32xf32>
    tpu.vector_store %arg12[%c0_35, %c0_36], %67 {strides = array<i32>} : memref<16x32xf32, #tpu.memory_space<vmem>>, vector<16x32xf32>,
    return
  }
  func.func @transform_0(%arg0: i32) -> (i32, i32) {
    %c0_i32 = arith.constant 0 : i32
    %c0_i32_0 = arith.constant 0 : i32
    %c0_i32_1 = arith.constant 0 : i32
    return %c0_i32, %c0_i32_0 : i32, i32
  }
  func.func @transform_1(%arg0: i32) -> (i32, i32) {
    %c0_i32 = arith.constant 0 : i32
    %c0_i32_0 = arith.constant 0 : i32
    %c0_i32_1 = arith.constant 0 : i32
    return %c0_i32, %c0_i32_0 : i32, i32
  }
  func.func @transform_2(%arg0: i32) -> (i32, i32) {
    %c0_i32 = arith.constant 0 : i32
    %c0_i32_0 = arith.constant 0 : i32
    %c0_i32_1 = arith.constant 0 : i32
    return %c0_i32, %c0_i32_0 : i32, i32
  }
  func.func @transform_3(%arg0: i32) -> (i32, i32) {
    %c0_i32 = arith.constant 0 : i32
    %c0_i32_0 = arith.constant 0 : i32
    %c0_i32_1 = arith.constant 0 : i32
    return %c0_i32, %c0_i32_0 : i32, i32
  }
  func.func @transform_4(%arg0: i32) -> (i32, i32) {
    %c0_i32 = arith.constant 0 : i32
    %c0_i32_0 = arith.constant 0 : i32
    %c0_i32_1 = arith.constant 0 : i32
    return %c0_i32, %c0_i32_0 : i32, i32
  }
  func.func @transform_5(%arg0: i32) -> (i32, i32) {
    %c0_i32 = arith.constant 0 : i32
    %c0_i32_0 = arith.constant 0 : i32
    %c0_i32_1 = arith.constant 0 : i32
    return %c0_i32, %c0_i32_0 : i32, i32
  }
  func.func @transform_6(%arg0: i32) -> (i32, i32) {
    %c0_i32 = arith.constant 0 : i32
    %c0_i32_0 = arith.constant 0 : i32
    %c0_i32_1 = arith.constant 0 : i32
    return %c0_i32, %c0_i32_0 : i32, i32
  }
  func.func @transform_7(%arg0: i32) -> (i32, i32) {
    %c0_i32 = arith.constant 0 : i32
    %c0_i32_0 = arith.constant 0 : i32
    %c0_i32_1 = arith.constant 0 : i32
    return %c0_i32, %c0_i32_0 : i32, i32
  }
  func.func @transform_8(%arg0: i32) -> (i32, i32) {
    %c0_i32 = arith.constant 0 : i32
    %c0_i32_0 = arith.constant 0 : i32
    %c0_i32_1 = arith.constant 0 : i32
    return %c0_i32, %c0_i32_0 : i32, i32
  }
  func.func @transform_9(%arg0: i32) -> (i32, i32) {
    %c0_i32 = arith.constant 0 : i32
    %c0_i32_0 = arith.constant 0 : i32
    %c0_i32_1 = arith.constant 0 : i32
    return %c0_i32, %c0_i32_0 : i32, i32
  }
  func.func @transform_10(%arg0: i32) -> (i32, i32) {
    %c0_i32 = arith.constant 0 : i32
    %c0_i32_0 = arith.constant 0 : i32
    %c0_i32_1 = arith.constant 0 : i32
    return %c0_i32, %c0_i32_0 : i32, i32
  }
  func.func @transform_11(%arg0: i32) -> (i32, i32) {
    %c0_i32 = arith.constant 0 : i32
    %c0_i32_0 = arith.constant 0 : i32
    %c0_i32_1 = arith.constant 0 : i32
    return %c0_i32, %c0_i32_0 : i32, i32
  }
}

</mosaic_0001>

<bundles_post_ra>
// kernel: emg_mlp_encoder.1
= control target key start
LH: loop header
LB: loop body
LE: loop exit
PB: predicated region body
PF: predicated region fallthrough
CT: control target
= control target key end

     0   :  { %vm59_vm0 = vcmask 130048   ;;  %s576_s0 = inlined_call_operand.vmem [shape: bf16[16,16], index: 0, kind: input, shape index: {}]   ;;  %s577_s1 = inlined_call_operand.vmem [shape: bf16[16,64], index: 1, kind: input, shape index: {}]   ;;  %s578_s2 = inlined_call_operand.vmem [shape: f32[1,64], index: 2, kind: input, shape index: {}]   ;;  %s579_s3 = inlined_call_operand.vmem [shape: f32[1,64], index: 3, kind: input, shape index: {}]   ;;  %s580_s4 = inlined_call_operand.vmem [shape: f32[1,64], index: 4, kind: input, shape index: {}]   ;;  %s581_s5 = inlined_call_operand.vmem [shape: bf16[64,128], index: 5, kind: input, shape index: {}]   ;;  %s582_s6 = inlined_call_operand.vmem [shape: f32[1,128], index: 6, kind: input, shape index: {}]   ;;  %s583_s7 = inlined_call_operand.vmem [shape: f32[1,128], index: 7, kind: input, shape index: {}]   ;;  %s584_s8 = inlined_call_operand.vmem [shape: f32[1,128], index: 8, kind: input, shape index: {}]   ;;  %s585_s9 = inlined_call_operand.vmem [shape: bf16[128,32], index: 9, kind: input, shape index: {}]   ;;  %s586_s10 = inlined_call_operand.vmem [shape: f32[1,32], index: 10, kind: input, shape index: {}]   ;;  %s587_s11 = inlined_call_operand.hbm [shape: f32[16,32], index: 11, kind: output, shape index: {}]  }
   0x1   :  { %v391_v0 = vld [vmem:[%s577_s1] sm:$0xff] }
   0x2   :  { %v390_v1 = vld [vmem:[%s576_s0] sm:$0xff]  ;;  %70 = vmatpush.bf16.msra.mxu0 %v391_v0 }
   0x3   :  { %16 = vsyncpa [#allocation3], 0  ;;  %v407_v3 = vld [vmem:[%s578_s2] ss:$0 sm:$0xff]  ;;  %vm81_vm1 = vcmask 523264   ;;  %v395_v23 = vld [vmem:[%s581_s5 + $0x18] sm:$0xff] }
   0x4   :  { %172 = vmatpush.bf16.msra.mxu1 %v395_v23  ;;  %v394_v27 = vld [vmem:[%s581_s5 + $0x10] sm:$0xff]  ;;  %v393_v30 = vld [vmem:[%s581_s5 + $0x8] sm:$0xff]  ;;  %v392_v33 = vld [vmem:[%s581_s5] sm:$0xff]  ;;  %vm311_vm8 = vcmask 261120   ;;  %s443_s12 = smov 128  }
   0x5   :  { %340 = vmatmul.msk.bf16.vlgmr.msra.gmra.mxu0 %vm59_vm0, %v390_v1  ;;  %v79_v43 = vld [vmem:[%s579_s3] sm:$0x1]  ;;  %v403_v62 = vld [vmem:[%s585_s9 + $0x38] sm:$0xff]  ;;  %v402_v1 = vld [vmem:[%s585_s9 + $0x30] sm:$0xff]  ;;  %s444_s3 = smov 8  }
   0x6   :  { %v408_v48 = vld [vmem:[%s580_s4] ss:$0 sm:$0xff]  ;;  %297 = vmatpush.bf16.msra.mxu2 %v403_v62 }
   0x7   :  { %v409_v55 = vld [vmem:[%s582_s6] ss:$0 sm:$0xff] }
   0x8   :  { %173 = vmatpush.bf16.msra.mxu1 %v394_v27 }
   0xa   :  { %298 = vmatpush.bf16.msra.mxu2 %v402_v1 }
   0xc   :  { %174 = vmatpush.bf16.msra.mxu1 %v393_v30 }
  0x10   :  { %175 = vmatpush.bf16.msra.mxu1 %v392_v33 }
  0x82   :  { %v72_v2 = vpop.f32.mrf.mxu0 }
  0x83   :  { %v73_v4 = vadd.f32 %v407_v3, %v72_v2 }
  0x85   :  { %v77_v6 = vmax.f32 %v73_v4, 0.0  ;;  %v401_v4 = vld [vmem:[%s585_s9 + $0x28] sm:$0xff] }
  0x86   :  { %299 = vmatpush.bf16.msra.mxu2 %v401_v4 }
  0x87   :  { %v82_v9 = vsel %vm81_vm1, %v77_v6, 0.0 }
  0x8a   :  { %v74_v5 = vpop.f32.mrf.mxu0 }
  0x8b   :  { %v75_v7 = vadd.f32 %v407_v3, %v74_v5 }
  0x8d   :  { %v78_v8 = vmax.f32 %v75_v7, 0.0  ;;  %v400_v7 = vld [vmem:[%s585_s9 + $0x20] sm:$0xff] }
  0x8e   :  { %300 = vmatpush.bf16.msra.mxu2 %v400_v7 }
  0x8f   :  { %v83_v10 = vsel %vm81_vm1, %v78_v8, 0.0 }
  0x90   :  { %v84_v11 = vadd.f32 %v83_v10, %v82_v9 }
  0x92   :  { %v85_v12 = vrot.slane %v84_v11, 4 }
  0x94   :  { %v86_v13 = vadd.f32 %v85_v12, %v84_v11  ;;  %v399_v11 = vld [vmem:[%s585_s9 + $0x18] sm:$0xff] }
  0x95   :  { %301 = vmatpush.bf16.msra.mxu2 %v399_v11 }
  0x96   :  { %v87_v14 = vrot.slane %v86_v13, 2 }
  0x98   :  { %v88_v15 = vadd.f32 %v87_v14, %v86_v13 }
  0x9a   :  { %v89_v16 = vrot.slane %v88_v15, 1 }
  0x9c   :  { %v90_v17 = vadd.f32 %v89_v16, %v88_v15  ;;  %v398_v15 = vld [vmem:[%s585_s9 + $0x10] sm:$0xff] }
  0x9d   :  { %302 = vmatpush.bf16.msra.mxu2 %v398_v15 }
  0x9e   :  { %v91_v18 = vmul.f32 0.0625, %v90_v17 }
  0xa0   :  { %v92_v19 = vsub.f32 %v77_v6, %v91_v18  ;;  %v93_v20 = vsub.f32 %v78_v8, %v91_v18  ;;  %v397_v18 = vld [vmem:[%s585_s9 + $0x8] sm:$0xff] }
  0xa1   :  { %303 = vmatpush.bf16.msra.mxu2 %v397_v18 }
  0xa2   :  { %v94_v21 = vmul.f32 %v92_v19, %v92_v19  ;;  %v95_v22 = vmul.f32 %v93_v20, %v93_v20 }
  0xa4   :  { %v96_v24 = vsel %vm81_vm1, %v94_v21, 0.0  ;;  %v97_v25 = vsel %vm81_vm1, %v95_v22, 0.0  ;;  %v396_v21 = vld [vmem:[%s585_s9] sm:$0xff] }
  0xa5   :  { %v98_v26 = vadd.f32 %v97_v25, %v96_v24  ;;  %304 = vmatpush.bf16.msra.mxu2 %v396_v21 }
  0xa7   :  { %v99_v28 = vrot.slane %v98_v26, 4 }
  0xa9   :  { %v100_v29 = vadd.f32 %v99_v28, %v98_v26 }
  0xab   :  { %v101_v31 = vrot.slane %v100_v29, 2 }
  0xad   :  { %v102_v32 = vadd.f32 %v101_v31, %v100_v29  ;;  %v184_v31 = vld [vmem:[%s583_s7] sm:$0x1]  ;;  %s442_s7 = smov [#allocation2]  }
  0xae   :  { %s318_s29 = sshll.u32 %s442_s7, 4  ;;  %s319_s29 = int_to_ptr.vmem [resolvable:$true] %s318_s29 }
  0xaf   :  { %v103_v34 = vrot.slane %v102_v32, 1 }
  0xb1   :  { %v104_v35 = vadd.f32 %v103_v34, %v102_v32 }
  0xb3   :  { %v105_v36 = vmul.f32 0.0625, %v104_v35 }
  0xb5   :  { %v106_v37 = vadd.f32 1e-05, %v105_v36  ;;  %v410_v36 = vld [vmem:[%s584_s8] ss:$0 sm:$0xff]  ;;  %s320_s8 = sshll.u32 %s587_s11, 4  ;;  %s321_s8 = int_to_ptr.hbm [resolvable:$true] %s320_s8 }
  0xb7   :  { %412 = vrsqrt.f32 %v106_v37  ;;  %vm113_vm3 = vweird.f32 %v106_v37 }
  0xbd   :  { %v413_v38 = vpop.eup %412 }
  0xbe   :  { %v108_v39 = vmul.f32 %v413_v38, %v106_v37  ;;  %vm114_vm2 = vweird.f32 %v413_v38 }
  0xbf   :  { %vm115_vm4 = vmor %vm113_vm3, %vm114_vm2 }
  0xc0   :  { %v109_v40 = vmul.f32 %v413_v38, %v108_v39 }
  0xc2   :  { %v110_v41 = vmul.f32 0.5, %v109_v40 }
  0xc4   :  { %v111_v42 = vsub.f32 1.5, %v110_v41 }
  0xc6   :  { %v112_v44 = vmul.f32 %v413_v38, %v111_v42  ;;  %v411_v42 = vld [vmem:[%s586_s10] ss:$0 sm:$0xff] }
  0xc8   :  { %v116_v45 = vsel %vm115_vm4, %v413_v38, %v112_v44 }
  0xc9   :  { %v117_v46 = vmul.f32 %v116_v45, %v79_v43 }
  0xcb   :  { %v119_v47 = vperm.slane %v117_v46, 0 }
  0xcd   :  { %v122_v49 = vmul.f32 %v119_v47, %v93_v20  ;;  %v121_v50 = vmul.f32 %v119_v47, %v92_v19 }
  0xcf   :  { %v126_v51 = vadd.f32 %v408_v48, %v121_v50  ;;  %v127_v52 = vadd.f32 %v408_v48, %v122_v49 }
  0xd1   :  { %v128_v53 = vpack.c.bf16 %v127_v52, %v126_v51 }
  0xd3   :  { %357 = vmatmul.msk.bf16.vlgmr.msra.gmra.mxu1 %vm81_vm1, %v128_v53 }
 0x150   :  { %v177_v54 = vpop.f32.mrf.mxu1 }
 0x151   :  { %v178_v56 = vadd.f32 %v409_v55, %v177_v54 }
 0x153   :  { %v182_v59 = vmax.f32 %v178_v56, 0.0 }
 0x158   :  { %v179_v57 = vpop.f32.mrf.mxu1 }
 0x159   :  { %v180_v58 = vadd.f32 %v409_v55, %v179_v57 }
 0x15b   :  { %v183_v60 = vmax.f32 %v180_v58, 0.0 }
 0x15d   :  { %v186_v61 = vadd.f32 %v183_v60, %v182_v59 }
 0x15f   :  { %v187_v63 = vrot.slane %v186_v61, 4 }
 0x161   :  { %v188_v0 = vadd.f32 %v187_v63, %v186_v61 }
 0x163   :  { %v189_v2 = vrot.slane %v188_v0, 2 }
 0x165   :  { %v190_v3 = vadd.f32 %v189_v2, %v188_v0 }
 0x167   :  { %v191_v5 = vrot.slane %v190_v3, 1 }
 0x169   :  { %v192_v6 = vadd.f32 %v191_v5, %v190_v3 }
 0x16b   :  { %v193_v8 = vmul.f32 0.0625, %v192_v6 }
 0x16d   :  { %v194_v9 = vsub.f32 %v182_v59, %v193_v8  ;;  %v195_v10 = vsub.f32 %v183_v60, %v193_v8 }
 0x16f   :  { %v196_v12 = vmul.f32 %v194_v9, %v194_v9  ;;  %v197_v13 = vmul.f32 %v195_v10, %v195_v10 }
 0x171   :  { %v198_v14 = vadd.f32 %v197_v13, %v196_v12 }
 0x173   :  { %v199_v16 = vrot.slane %v198_v14, 4 }
 0x175   :  { %v200_v17 = vadd.f32 %v199_v16, %v198_v14 }
 0x177   :  { %v201_v19 = vrot.slane %v200_v17, 2 }
 0x179   :  { %v202_v20 = vadd.f32 %v201_v19, %v200_v17 }
 0x17b   :  { %v203_v22 = vrot.slane %v202_v20, 1 }
 0x17d   :  { %v204_v23 = vadd.f32 %v203_v22, %v202_v20 }
 0x17f   :  { %v205_v24 = vmul.f32 0.0625, %v204_v23 }
 0x181   :  { %v206_v25 = vadd.f32 1e-05, %v205_v24 }
 0x183   :  { %414 = vrsqrt.f32 %v206_v25  ;;  %vm213_vm6 = vweird.f32 %v206_v25 }
 0x189   :  { %v415_v26 = vpop.eup %414 }
 0x18a   :  { %v208_v27 = vmul.f32 %v415_v26, %v206_v25  ;;  %vm214_vm5 = vweird.f32 %v415_v26 }
 0x18b   :  { %vm215_vm7 = vmor %vm213_vm6, %vm214_vm5 }
 0x18c   :  { %v209_v28 = vmul.f32 %v415_v26, %v208_v27 }
 0x18e   :  { %v210_v29 = vmul.f32 0.5, %v209_v28 }
 0x190   :  { %v211_v30 = vsub.f32 1.5, %v210_v29 }
 0x192   :  { %v212_v32 = vmul.f32 %v415_v26, %v211_v30 }
 0x194   :  { %v216_v33 = vsel %vm215_vm7, %v415_v26, %v212_v32 }
 0x195   :  { %v217_v34 = vmul.f32 %v216_v33, %v184_v31 }
 0x197   :  { %v219_v35 = vperm.slane %v217_v34, 0 }
 0x199   :  { %v222_v37 = vmul.f32 %v219_v35, %v195_v10  ;;  %v221_v38 = vmul.f32 %v219_v35, %v194_v9 }
 0x19b   :  { %v226_v39 = vadd.f32 %v410_v36, %v221_v38  ;;  %v227_v40 = vadd.f32 %v410_v36, %v222_v37 }
 0x19d   :  { %v228_v41 = vpack.c.bf16 %v227_v40, %v226_v39 }
 0x19f   :  { %305 = vmatmul.bf16.vlgmr.msra.gmra.mxu2 %v228_v41 }
 0x222   :  { %v306_v43 = vpop.f32.mrf.mxu2 }
 0x223   :  { %v307_v44 = vadd.f32 %v411_v42, %v306_v43 }
 0x225   :  { %312 = vst.msk [vmem:[#allocation2] sm:$0xff] %vm311_vm8, %v307_v44 }
 0x22a   :  { %v308_v45 = vpop.f32.mrf.mxu2 }
 0x22b   :  { %v309_v46 = vadd.f32 %v411_v42, %v308_v45 }
 0x22d   :  { %313 = vst.msk [vmem:[#allocation2 + $0x8] sm:$0xff] %vm311_vm8, %v309_v46 }
 0x22e   :  { %326 = dma.vmem_to_hbm [thread:$0]  %s319_s29, 256, %s321_s8, [#allocation3], %s443_s12, %s443_s12, %s444_s3  }
 0x22f   :  { %440 = dma.done.wait [#allocation3], 256  }
 0x230   :  { %441 = vsyncadd [#allocation3], 4294967040 }
 0x231   :  { %331 = vsyncpa [#allocation3], 1 }

</bundles_post_ra>
